<compile_context>
chip_gen: v7x
topology: tpu7x:2x2x1
jax: 0.10.0
libtpu: 0.0.40
codegen_flags: <defaults>
</compile_context>

<pallas_src>
import functools

import jax
import jax.numpy as jnp
from jax import lax
from jax.experimental import pallas as pl
from jax.experimental.pallas import tpu as pltpu


def _int_pow(v, n):
    """Trace-time unrolled integer power (pure VPU multiplies, no EUP exp/log)."""
    if n == 0:
        return jnp.ones_like(v)
    r = v
    for _ in range(n - 1):
        r = r * v
    return r


def _focal_loss_kernel(x_ref, t_ref, out_ref, *, alpha, gamma, epsilon,
                       tile_rows, valid_rows, mask_rows):
    x = x_ref[...].astype(jnp.float32)
    t = t_ref[...].astype(jnp.float32)

    p = jax.nn.sigmoid(x)          # logits = sigmoid(input), matches PyTorch reference
    q = 1.0 - p

    # Specialize pow for integer gamma (default gamma=2.0): VPU multiplies instead of
    # exp(gamma*log(x)) on the single EUP port.
    if float(gamma) == float(int(gamma)) and 0 <= int(gamma) <= 8:
        pow_q = _int_pow(q, int(gamma))
        pow_p = _int_pow(p, int(gamma))
    else:
        pow_q = jnp.power(q, gamma)
        pow_p = jnp.power(p, gamma)

    # Keeps the (p + eps).log() formulation of the PyTorch module exactly
    # (including its saturation behaviour for |x| >~ 17).
    pos = (-alpha) * t * pow_q * jnp.log(p + epsilon)
    neg = (-(1.0 - alpha)) * (1.0 - t) * pow_p * jnp.log(q + epsilon)
    loss = pos + neg

    if mask_rows:
        # Zero out padded rows exactly (cheap VPU compare + select).
        row0 = pl.program_id(0) * tile_rows
        rows = row0 + lax.broadcasted_iota(jnp.int32, loss.shape, 0)
        loss = jnp.where(rows < valid_rows, loss, 0.0)

    # Per-block partial sum; written unconditionally every grid step (no cross-step
    # state). Reduce is mostly VPU vreg adds + one small XLU reduce.
    total = jnp.sum(loss)
    out_ref[...] = jnp.full(out_ref.shape, total, dtype=out_ref.dtype)


def binary_focal_loss(input, target, *, alpha=0.25, gamma=2.0, epsilon=1e-9,
                      tile_rows=None):
    """Pallas TPU implementation of BinaryFocalLoss.forward (returns scalar mean)."""
    assert input.shape == target.shape
    B, C = input.shape
    n_total = float(B * C)  # true element count; padded rows contribute exactly 0

    x = input.astype(jnp.float32)
    # Target is 0/1 multi-hot -> exact in bf16; halves its HBM traffic.
    t = target.astype(jnp.bfloat16)

    # ---- tile size: big row blocks to amortize per-grid-step overhead ----
    # VMEM per step: x f32 (x2 buffers) + t bf16 (x2 buffers) = 12 B/elem.
    # tile_rows*C*4 <= ~2 MiB keeps total ~6 MiB, well under scoped-VMEM defaults.
    if tile_rows is None:
        budget_f32_elems = (2 * 1024 * 1024) // 4
        tile_rows = max(8, (budget_f32_elems // max(C, 1) // 8) * 8)
        tile_rows = min(tile_rows, 2048)
    tile_rows = max(8, (tile_rows // 8) * 8)
    # Don't tile past the (rounded-up) batch.
    tile_rows = min(tile_rows, max(8, ((B + 7) // 8) * 8))

    num_blocks = -(-B // tile_rows)
    B_pad = num_blocks * tile_rows
    pad_rows = B_pad - B
    if pad_rows > 0:
        # Pad with zeros; padded rows are explicitly masked to 0 inside the kernel.
        x = jnp.concatenate([x, jnp.zeros((pad_rows, C), jnp.float32)], axis=0)
        t = jnp.concatenate([t, jnp.zeros((pad_rows, C), jnp.bfloat16)], axis=0)

    kernel = functools.partial(
        _focal_loss_kernel,
        alpha=float(alpha),
        gamma=float(gamma),
        epsilon=float(epsilon),
        tile_rows=tile_rows,
        valid_rows=B,
        mask_rows=pad_rows > 0,
    )

    # One lane-dense (1, 1, 128) partial-sum block per grid step (scalar broadcast
    # across lanes); final sum + mean done in the wrapper.
    partials = pl.pallas_call(
        kernel,
        out_shape=jax.ShapeDtypeStruct((num_blocks, 1, 128), jnp.float32),
        grid_spec=pltpu.PrefetchScalarGridSpec(
            num_scalar_prefetch=0,
            grid=(num_blocks,),
            in_specs=[
                pl.BlockSpec((tile_rows, C), lambda i: (i, 0)),
                pl.BlockSpec((tile_rows, C), lambda i: (i, 0)),
            ],
            out_specs=pl.BlockSpec((1, 1, 128), lambda i: (i, 0, 0)),
        ),
        compiler_params=pltpu.CompilerParams(
            dimension_semantics=("parallel",),
        ),
    )(x, t)

    return jnp.sum(partials[:, 0, 0]) / n_total


def binary_focal_loss_ref(input, target, alpha=0.25, gamma=2.0, epsilon=1e-9):
    p = jax.nn.sigmoid(input.astype(jnp.float32))
    t = target.astype(jnp.float32)
    loss = -alpha * t * jnp.power(1.0 - p, gamma) * jnp.log(p + epsilon)
    loss += -(1.0 - alpha) * (1.0 - t) * jnp.power(p, gamma) * jnp.log(1.0 - p + epsilon)
    return jnp.mean(loss)


if __name__ == "__main__":
    key = jax.random.PRNGKey(0)
    k1, k2 = jax.random.split(key)

    B, C = 16, 128  # [batch_size, num_cls]
    logits = jax.random.normal(k1, (B, C), dtype=jnp.float32)
    target = (jax.random.uniform(k2, (B, C)) > 0.5).astype(jnp.float32)  # multi-hot labels

    out = jax.block_until_ready(binary_focal_loss(logits, target))
    ref = binary_focal_loss_ref(logits, target)
    assert jnp.allclose(out, ref, rtol=1e-5, atol=1e-6), (out, ref)

    # Also exercise a ragged / larger batch to check the padding + masking path.
    B2 = 50
    logits2 = jax.random.normal(k1, (B2, C), dtype=jnp.float32)
    target2 = (jax.random.uniform(k2, (B2, C)) > 0.5).astype(jnp.float32)
    out2 = jax.block_until_ready(binary_focal_loss(logits2, target2, tile_rows=8))
    ref2 = binary_focal_loss_ref(logits2, target2)
    assert jnp.allclose(out2, ref2, rtol=1e-5, atol=1e-6), (out2, ref2)

    print("KERNEL_OK")
</pallas_src>

<mosaic_0001>
module attributes {stable_mosaic.version = 11 : i64} {
  func.func @_focal_loss_kernel(%arg0: i32, %arg1: memref<16x128xf32, #tpu.memory_space<vmem>>, %arg2: memref<16x128xbf16, #tpu.memory_space<vmem>>, %arg3: memref<1x1x128xf32, #tpu.memory_space<vmem>>) attributes {dimension_semantics = [#tpu.dimension_semantics<parallel>], iteration_bounds = array<i64: 1>, scalar_prefetch = 0 : i64, scratch_operands = 0 : i64, tpu.core_type = #tpu.core_type<tc>, window_params = [{transform_indices = @transform_0, window_bounds = array<i64: 16, 128>}, {transform_indices = @transform_1, window_bounds = array<i64: 16, 128>}, {transform_indices = @transform_2, window_bounds = array<i64: 1, 1, 128>}]} {
    %c0 = arith.constant 0 : index
    %c0_0 = arith.constant 0 : index
    %0 = vector.load %arg1[%c0, %c0_0] : memref<16x128xf32, #tpu.memory_space<vmem>>, vector<16x128xf32>
    %c0_1 = arith.constant 0 : index
    %c0_2 = arith.constant 0 : index
    %1 = vector.load %arg2[%c0_1, %c0_2] : memref<16x128xbf16, #tpu.memory_space<vmem>>, vector<16x128xbf16>
    %2 = arith.extf %1 : vector<16x128xbf16> to vector<16x128xf32>
    %3 = arith.negf %0 : vector<16x128xf32>
    %4 = math.exp %3 : vector<16x128xf32>
    %cst = arith.constant 1.000000e+00 : f32
    %5 = vector.broadcast %cst : f32 to vector<16x128xf32>
    %6 = arith.addf %5, %4 : vector<16x128xf32>
    %7 = arith.divf %5, %6 : vector<16x128xf32>
    %cst_3 = arith.constant 1.000000e+00 : f32
    %8 = vector.broadcast %cst_3 : f32 to vector<16x128xf32>
    %9 = arith.subf %8, %7 : vector<16x128xf32>
    %10 = arith.mulf %9, %9 : vector<16x128xf32>
    %11 = arith.mulf %7, %7 : vector<16x128xf32>
    %cst_4 = arith.constant -2.500000e-01 : f32
    %12 = vector.broadcast %cst_4 : f32 to vector<16x128xf32>
    %13 = arith.mulf %12, %2 : vector<16x128xf32>
    %14 = arith.mulf %13, %10 : vector<16x128xf32>
    %cst_5 = arith.constant 9.99999971E-10 : f32
    %15 = vector.broadcast %cst_5 : f32 to vector<16x128xf32>
    %16 = arith.addf %7, %15 : vector<16x128xf32>
    %17 = math.log %16 : vector<16x128xf32>
    %18 = arith.mulf %14, %17 : vector<16x128xf32>
    %cst_6 = arith.constant 1.000000e+00 : f32
    %19 = vector.broadcast %cst_6 : f32 to vector<16x128xf32>
    %20 = arith.subf %19, %2 : vector<16x128xf32>
    %cst_7 = arith.constant -7.500000e-01 : f32
    %21 = vector.broadcast %cst_7 : f32 to vector<16x128xf32>
    %22 = arith.mulf %21, %20 : vector<16x128xf32>
    %23 = arith.mulf %22, %11 : vector<16x128xf32>
    %cst_8 = arith.constant 9.99999971E-10 : f32
    %24 = vector.broadcast %cst_8 : f32 to vector<16x128xf32>
    %25 = arith.addf %9, %24 : vector<16x128xf32>
    %26 = math.log %25 : vector<16x128xf32>
    %27 = arith.mulf %23, %26 : vector<16x128xf32>
    %28 = arith.addf %18, %27 : vector<16x128xf32>
    %29 = vector.shape_cast %28 : vector<16x128xf32> to vector<1x16x128xf32>
    %cst_9 = arith.constant dense<0.000000e+00> : vector<1xf32>
    %30 = vector.multi_reduction <add>, %29, %cst_9 [1, 2] : vector<1x16x128xf32> to vector<1xf32>
    %31 = vector.shape_cast %30 : vector<1xf32> to vector<1x1x1xf32>
    %32 = vector.extract %31[0, 0, 0] : f32 from vector<1x1x1xf32>
    %33 = vector.broadcast %32 : f32 to vector<1x1x128xf32>
    %c0_10 = arith.constant 0 : index
    %c0_11 = arith.constant 0 : index
    %c0_12 = arith.constant 0 : index
    %34 = vector.load %arg3[%c0_10, %c0_11, %c0_12] : memref<1x1x128xf32, #tpu.memory_space<vmem>>, vector<1x1x128xf32>
    tpu.vector_store %arg3[%c0_10, %c0_11, %c0_12], %33 {strides = array<i32>} : memref<1x1x128xf32, #tpu.memory_space<vmem>>, vector<1x1x128xf32>,
    return
  }
  func.func @transform_0(%arg0: i32) -> (i32, i32) {
    %c0_i32 = arith.constant 0 : i32
    %c0_i32_0 = arith.constant 0 : i32
    return %arg0, %c0_i32 : i32, i32
  }
  func.func @transform_1(%arg0: i32) -> (i32, i32) {
    %c0_i32 = arith.constant 0 : i32
    %c0_i32_0 = arith.constant 0 : i32
    return %arg0, %c0_i32 : i32, i32
  }
  func.func @transform_2(%arg0: i32) -> (i32, i32, i32) {
    %c0_i32 = arith.constant 0 : i32
    %c0_i32_0 = arith.constant 0 : i32
    %c0_i32_1 = arith.constant 0 : i32
    return %arg0, %c0_i32, %c0_i32_0 : i32, i32, i32
  }
}

</mosaic_0001>

<bundles_post_ra>
// kernel: tpu_custom_call.1
= control target key start
LH: loop header
LB: loop body
LE: loop exit
PB: predicated region body
PF: predicated region fallthrough
CT: control target
= control target key end

     0   :  { %7 = vsyncpa [#allocation3], 0  ;;  %s281_s0 = inlined_call_operand.hbm [shape: f32[16,128], index: 0, kind: input, shape index: {}]   ;;  %s282_s1 = inlined_call_operand.hbm [shape: bf16[16,128], index: 1, kind: input, shape index: {}]   ;;  %s283_s2 = inlined_call_operand.hbm [shape: f32[1,1,128], index: 2, kind: output, shape index: {}]  }
   0x1   :  { %8 = vsyncpa [#allocation6], 0 }
   0x2   :  { %9 = vsyncpa [#allocation4], 0  ;;  %s223_s9 = smov [#allocation2]   ;;  %s151_s13 = scalar_lea.hbm %s281_s0, 256 }
   0x3   :  { %s15_s10 = sshll.u32 %s223_s9, 4  ;;  %p152_p0 = scmp.ne.s32.totalorder %s281_s0, %s151_s13  ;;  %s16_s10 = int_to_ptr.vmem [resolvable:$true] %s15_s10 }
   0x4   :  { %p155_p1 = scmp.lt.u32.totalorder %s151_s13, %s281_s0 }
   0x6   :  { %p157_p2 = pnand %p155_p1, %p152_p0 }
   0x8   :  { %160 = shalt.err (!%p157_p2)
}
   0x9   :  { %s161_s18 = scalar_lea.vmem %s16_s10, 256  ;;  %p166_p4 = scmp.lt.s32.totalorder %s16_s10, %s16_s10 }
   0xa   :  { %p162_p3 = scmp.ne.s32.totalorder %s16_s10, %s161_s18  ;;  %p167_p5 = scmp.lt.s32.totalorder %s161_s18, %s161_s18 }
   0xc   :  { %p168_p6 = por %p167_p5, %p166_p4 }
   0xe   :  { %p169_p7 = pnand %p168_p6, %p162_p3 }
  0x10   :  { %172 = shalt.err (!%p169_p7)
}
  0x11   :  { %s224_s19 = smov 128   ;;  %s225_s20 = smov 8  }
  0x12   :  { %21 = dma.hbm_to_vmem [thread:$0]  %s281_s0, 256, %s16_s10, [#allocation3], %s224_s19, %s224_s19, %s225_s20  }
  0x13   :  { %s226_s23 = smov [#allocation5]   ;;  %s173_s27 = scalar_lea.hbm %s282_s1, 128 }
  0x14   :  { %s27_s24 = sshll.u32 %s226_s23, 4  ;;  %p174_p8 = scmp.ne.s32.totalorder %s282_s1, %s173_s27  ;;  %s28_s24 = int_to_ptr.vmem [resolvable:$true] %s27_s24 }
  0x15   :  { %p177_p9 = scmp.lt.u32.totalorder %s173_s27, %s282_s1 }
  0x17   :  { %p179_p10 = pnand %p177_p9, %p174_p8 }
  0x19   :  { %182 = shalt.err (!%p179_p10)
}
  0x1a   :  { %s183_s4 = scalar_lea.vmem %s28_s24, 128  ;;  %p188_p12 = scmp.lt.s32.totalorder %s28_s24, %s28_s24 }
  0x1b   :  { %p184_p11 = scmp.ne.s32.totalorder %s28_s24, %s183_s4  ;;  %p189_p13 = scmp.lt.s32.totalorder %s183_s4, %s183_s4 }
  0x1d   :  { %p190_p0 = por %p189_p13, %p188_p12 }
  0x1f   :  { %p191_p1 = pnand %p190_p0, %p184_p11 }
  0x21   :  { %194 = shalt.err (!%p191_p1)
}
  0x22   :  { %s227_s0 = smov 64   ;;  %s228_s5 = smov 4  }
  0x23   :  { %33 = dma.hbm_to_vmem [thread:$0]  %s282_s1, 128, %s28_s24, [#allocation6], %s227_s0, %s227_s0, %s228_s5  }
  0x24   :  { %217 = dma.done.wait [#allocation3], 256  }
  0x25   :  { %218 = vsyncadd [#allocation3], 4294967040 }
  0x26   :  { %219 = dma.done.wait [#allocation6], 128  }
  0x27   :  { %220 = vsyncadd [#allocation6], 4294967168  ;;  %v40_v0 = vld [vmem:[#allocation2] sm:$0xff]  ;;  %v41_v1 = vld [vmem:[#allocation2 + $0x8] sm:$0xff]  ;;  %s229_s1 = smov [#allocation7]  }
  0x28   :  { %v120_v2 = vmul.f32 -1.442695, %v40_v0  ;;  %v121_v3 = vmul.f32 -1.442695, %v41_v1  ;;  %v123_v8 = vld [vmem:[#allocation5] sm:$0xff]   ;;  %s110_s8 = sshll.u32 %s229_s1, 4  ;;  %s111_s8 = int_to_ptr.vmem [resolvable:$true] %s110_s8 }
  0x29   :  { %v124_v13 = vunpack.c.l.bf16 %v123_v8  ;;  %v125_v16 = vunpack.c.h.bf16 %v123_v8  ;;  %s195_s10 = scalar_lea.vmem %s111_s8, 16  ;;  %s199_s11 = scalar_lea.vmem %s111_s8, 32 }
  0x2a   :  { %135 = vpow2.f32 %v120_v2  ;;  %p196_p2 = scmp.ne.s32.totalorder %s111_s8, %s195_s10  ;;  %p200_p3 = scmp.lt.s32.totalorder %s111_s8, %s111_s8 }
  0x2b   :  { %137 = vpow2.f32 %v121_v3  ;;  %v76_v19 = vsub.f32 1.0, %v124_v13  ;;  %v77_v20 = vsub.f32 1.0, %v125_v16  ;;  %v64_v22 = vmul.f32 -0.25, %v124_v13  ;;  %p201_p4 = scmp.lt.s32.totalorder %s199_s11, %s195_s10 }
  0x2c   :  { %v65_v24 = vmul.f32 -0.25, %v125_v16 }
  0x2d   :  { %v78_v26 = vmul.f32 -0.75, %v76_v19  ;;  %v79_v28 = vmul.f32 -0.75, %v77_v20  ;;  %p202_p5 = por %p201_p4, %p200_p3 }
  0x2f   :  { %p203_p6 = pnand %p202_p5, %p196_p2 }
  0x34   :  { %v136_v4 = vpop.eup %135 }
  0x35   :  { %v138_v5 = vpop.eup %137  ;;  %v52_v6 = vadd.f32 1.0, %v136_v4 }
  0x36   :  { %v53_v7 = vadd.f32 1.0, %v138_v5 }
  0x37   :  { %139 = vrcp.f32 %v52_v6 }
  0x38   :  { %141 = vrcp.f32 %v53_v7 }
  0x41   :  { %v140_v9 = vpop.eup %139 }
  0x42   :  { %v142_v10 = vpop.eup %141  ;;  %v58_v11 = vsub.f32 1.0, %v140_v9  ;;  %v68_v12 = vadd.f32 1e-09, %v140_v9  ;;  %v62_v25 = vmul.f32 %v140_v9, %v140_v9 }
  0x43   :  { %v59_v14 = vsub.f32 1.0, %v142_v10  ;;  %v69_v15 = vadd.f32 1e-09, %v142_v10  ;;  %v63_v27 = vmul.f32 %v142_v10, %v142_v10 }
  0x44   :  { %143 = vlog2.f32 %v68_v12  ;;  %v82_v17 = vadd.f32 1e-09, %v58_v11  ;;  %v60_v21 = vmul.f32 %v58_v11, %v58_v11  ;;  %v80_v34 = vmul.f32 %v78_v26, %v62_v25 }
  0x45   :  { %145 = vlog2.f32 %v69_v15  ;;  %v83_v18 = vadd.f32 1e-09, %v59_v14  ;;  %v61_v23 = vmul.f32 %v59_v14, %v59_v14  ;;  %v81_v37 = vmul.f32 %v79_v28, %v63_v27 }
  0x46   :  { %147 = vlog2.f32 %v82_v17  ;;  %v66_v29 = vmul.f32 %v64_v22, %v60_v21 }
  0x47   :  { %149 = vlog2.f32 %v83_v18  ;;  %v67_v31 = vmul.f32 %v65_v24, %v61_v23 }
  0x4e   :  { %v144_v30 = vpop.eup %143 }
  0x4f   :  { %v146_v32 = vpop.eup %145  ;;  %v71_v33 = vmul.f32 0.6931472, %v144_v30 }
  0x50   :  { %v148_v35 = vpop.eup %147  ;;  %v73_v36 = vmul.f32 0.6931472, %v146_v32 }
  0x51   :  { %v150_v38 = vpop.eup %149  ;;  %v74_v39 = vmul.f32 %v71_v33, %v66_v29  ;;  %v85_v40 = vmul.f32 0.6931472, %v148_v35 }
  0x52   :  { %v75_v41 = vmul.f32 %v73_v36, %v67_v31  ;;  %v87_v42 = vmul.f32 0.6931472, %v150_v38 }
  0x53   :  { %v88_v43 = vmul.f32 %v85_v40, %v80_v34 }
  0x54   :  { %v89_v44 = vmul.f32 %v87_v42, %v81_v37 }
  0x55   :  { %v90_v45 = vadd.f32 %v88_v43, %v74_v39 }
  0x56   :  { %v91_v46 = vadd.f32 %v89_v44, %v75_v41 }
  0x58   :  { %v92_v47 = vadd.f32 %v91_v46, %v90_v45 }
  0x5a   :  { %93 = vadd.xlane.f32.xlu0 %v92_v47 }
  0xe7   :  { %v94_v48 = vpop.xlane.xlu0 %93 }
  0xe8   :  { %v95_v49 = vrot.slane %v94_v48, 4 }
  0xea   :  { %v96_v50 = vadd.f32 %v95_v49, %v94_v48 }
  0xec   :  { %v97_v51 = vrot.slane %v96_v50, 2 }
  0xee   :  { %v98_v52 = vadd.f32 %v97_v51, %v96_v50 }
  0xf0   :  { %v99_v53 = vrot.slane %v98_v52, 1 }
  0xf2   :  { %v100_v54 = vadd.f32 %v99_v53, %v98_v52 }
  0xf4   :  { %126 = vpush %v100_v54 }
 0x125   :  { %s127_s9 = spop %126 }
 0x126   :  { %v102_v55 = vstv %s127_s9 }
 0x127   :  { %103 = vst [vmem:[#allocation7] sm:$0x1] %v102_v55 }
 0x128   :  { %206 = shalt.err (!%p203_p6)
}
 0x129   :  { %s207_s14 = scalar_lea.hbm %s283_s2, 16 }
 0x12a   :  { %p208_p7 = scmp.ne.s32.totalorder %s283_s2, %s207_s14  ;;  %p211_p8 = scmp.lt.u32.totalorder %s207_s14, %s283_s2 }
 0x12c   :  { %p213_p9 = pnand %p211_p8, %p208_p7 }
 0x12e   :  { %216 = shalt.err (!%p213_p9)
}
 0x12f   :  { %113 = dma.vmem_to_hbm [thread:$0]  %s111_s8, 16, %s283_s2, [#allocation4]  }
 0x130   :  { %221 = dma.done.wait [#allocation4], 16  }
 0x131   :  { %222 = vsyncadd [#allocation4], 4294967280 }
 0x132   :  { %117 = vsyncpa [#allocation3], 1 }
 0x133   :  { %118 = vsyncpa [#allocation6], 1 }
 0x134   :  { %119 = vsyncpa [#allocation4], 1 }

</bundles_post_ra>
